<compile_context>
chip_gen: v7x
topology: tpu7x:2x2x1
jax: 0.10.0
libtpu: 0.0.40
codegen_flags: <defaults>
</compile_context>

<pallas_src>
import functools

import numpy as np
import jax
import jax.numpy as jnp
from jax.experimental import pallas as pl
from jax.experimental.pallas import tpu as pltpu


# Largest flattened plane (A*S) for which we build the dense kron(W_a, W_s)
# operator.  bf16 operator bytes = 3 * N^2 * 2; N = 1024 -> 6 MiB (12 MiB
# double-buffered), comfortably inside every chip generation's VMEM.
_MAX_FUSED_N = 1024

# Conservative VMEM budget used when choosing the batch tile: keeps the
# pipelined input/output blocks well under the most conservative scoped
# default (16 MiB on v5e), so no chip-specific limit tuning is required.
_BATCH_TILE_VMEM_BUDGET = 8 * 1024 * 1024


@functools.lru_cache(maxsize=None)
def _kron_dft_operator(a: int, s: int):
    """Re, Im and (Re+Im) of K = kron(W_a, W_s), the dense 2-D DFT operator.

    For a row-major-flattened plane x_flat = X.reshape(a*s):
        fft2(X).reshape(a*s) == K @ x_flat,   and K is symmetric,
    so batched:  Y_flat = X_flat @ K.
    Built once per (a, s) on the host; baked into the jitted wrapper as
    compile-time constants.
    """
    ka = np.arange(a)
    ks = np.arange(s)
    wa = np.exp(-2j * np.pi * np.outer(ka, ka) / a)
    ws = np.exp(-2j * np.pi * np.outer(ks, ks) / s)
    k = np.kron(wa, ws).astype(np.complex64)
    kr = np.real(k).astype(np.float32)
    ki = np.imag(k).astype(np.float32)
    ksum = (kr + ki).astype(np.float32)
    return kr, ki, ksum


def _fft2_kernel(x_ref, kr_ref, ki_ref, ks_ref, o_ref):
    """One batch tile: (Bt, 2n) -> (Bt, 3n) with n = A*S."""
    n = kr_ref.shape[0]                     # static

    x = x_ref[...]                          # (Bt, 2n) float32
    # bf16 MXU operands, f32 accumulation (bf16-native MXU on all gens).
    xr = x[:, :n].astype(jnp.bfloat16)
    xi = x[:, n:].astype(jnp.bfloat16)
    xs = (x[:, :n] + x[:, n:]).astype(jnp.bfloat16)

    # 3-multiplication complex matmul (4 -> 3 real MXU matmuls).
    t1 = jnp.dot(xr, kr_ref[...], preferred_element_type=jnp.float32)
    t2 = jnp.dot(xi, ki_ref[...], preferred_element_type=jnp.float32)
    t3 = jnp.dot(xs, ks_ref[...], preferred_element_type=jnp.float32)
    yr = t1 - t2
    yi = t3 - t1 - t2

    # Single packed, lane-dense output block: [Re | Im | Abs], 128-aligned
    # lane slices -> unmasked stores.
    o_ref[:, 0 * n:1 * n] = yr
    o_ref[:, 1 * n:2 * n] = yi
    o_ref[:, 2 * n:3 * n] = jnp.sqrt(yr * yr + yi * yi)


def _pick_batch_tile(b: int, n: int) -> int:
    """How many batch planes to process per grid step."""
    # Per batch row: 2n f32 in + 3n f32 out, double-buffered by the pipeline.
    bytes_per_row = (2 * n + 3 * n) * 4 * 2
    bt = max(1, _BATCH_TILE_VMEM_BUDGET // bytes_per_row)
    if bt >= b:
        return b                            # whole batch in one block
    # Keep the second-to-last block dim a multiple of 8 for clean tiling; the
    # resulting multi-step "parallel" grid also shards across v7x's two TCs.
    return max(8, (bt // 8) * 8)


@jax.jit
def twod_fft_pallas(x):
    """(B, C, A, S) -> (B, 3, A, S) = [Re, Im, Abs] of fft2(x[:,0] + i*x[:,1])."""
    b, c, a, s = x.shape
    assert c >= 2, "need at least 2 channels (real / imag)"
    n = a * s

    if n > _MAX_FUSED_N:
        # TODO(synk): large planes need a separable / Cooley-Tukey Pallas kernel
        # (two batched MXU stages); fall back to XLA's FFT there.
        z = x[:, 0].astype(jnp.complex64) + 1j * x[:, 1].astype(jnp.complex64)
        y = jnp.fft.fft2(z)
        return jnp.stack([y.real, y.imag, jnp.abs(y)], axis=1)

    kr_np, ki_np, ks_np = _kron_dft_operator(a, s)
    kr = jnp.asarray(kr_np, dtype=jnp.bfloat16)
    ki = jnp.asarray(ki_np, dtype=jnp.bfloat16)
    ks = jnp.asarray(ks_np, dtype=jnp.bfloat16)

    # Metadata-only flatten: row b = [chan0(n) | chan1(n) | chan2(n) | ...].
    # The input BlockSpec reads only the first 2n lanes (channels 0/1), so no
    # host-side channel-slice copies are materialized in HBM.
    x_flat = x.reshape(b, c * n).astype(jnp.float32)

    bt = _pick_batch_tile(b, n)
    grid = (pl.cdiv(b, bt),)

    # NOTE: the K blocks are grid-invariant (index_map always (0, 0)) so they
    # stay resident in VMEM across grid steps; at N <= 1024 their footprint is
    # small enough that single-buffering (pl.Buffered(1)) is unnecessary.
    out_flat = pl.pallas_call(
        _fft2_kernel,
        out_shape=jax.ShapeDtypeStruct((b, 3 * n), jnp.float32),
        grid=grid,
        in_specs=[
            pl.BlockSpec((bt, 2 * n), lambda i: (i, 0)),   # channels 0/1, packed
            pl.BlockSpec((n, n), lambda i: (0, 0)),        # Re(K)
            pl.BlockSpec((n, n), lambda i: (0, 0)),        # Im(K)
            pl.BlockSpec((n, n), lambda i: (0, 0)),        # Re(K) + Im(K)
        ],
        out_specs=pl.BlockSpec((bt, 3 * n), lambda i: (i, 0)),
        compiler_params=pltpu.CompilerParams(
            dimension_semantics=("parallel",),
            vmem_limit_bytes=48 * 1024 * 1024,   # headroom for larger Bt / planes
        ),
    )(x_flat, kr, ki, ks)

    # Metadata-only reshape back to (B, 3, A, S) = [Re, Im, Abs].
    return out_flat.reshape(b, 3, a, s)


def twod_fft_forward(x, key, p=0.5):
    """Full module semantics: apply the transform with probability p, else identity."""
    # TODO(synk): the coin flip must resolve on the host (one device sync per
    # call) because the two branches return different channel counts (3 vs C),
    # so they cannot be traced into a single jitted program.
    if float(jax.random.uniform(key)) < p:
        return twod_fft_pallas(x)
    return x


if __name__ == "__main__":
    key = jax.random.PRNGKey(0)
    k_x, k_p = jax.random.split(key)
    # Small shapes consistent with the module's (b, c, a, s) layout.
    x = jax.random.normal(k_x, (2, 4, 16, 16), dtype=jnp.float32)

    out = jax.block_until_ready(twod_fft_pallas(x))
    assert out.shape == (2, 3, 16, 16), out.shape

    # Reference: jnp.fft.fft2 (same semantics as torch.fft.fft2).
    xc = x[:, 0].astype(jnp.complex64) + 1j * x[:, 1].astype(jnp.complex64)
    ref = jnp.fft.fft2(xc)
    ref_out = jnp.stack([ref.real, ref.imag, jnp.abs(ref)], axis=1)
    # bf16 MXU operands (f32 accumulation) => magnitude-normalized tolerance.
    err = float(jnp.max(jnp.abs(out - ref_out)) / jnp.max(jnp.abs(ref_out)))
    assert err < 2e-2, f"normalized max error {err} vs fft2 reference"

    # Exercise the probabilistic forward as well (either branch is valid).
    _ = jax.block_until_ready(twod_fft_forward(x, k_p, p=0.5))

    print("KERNEL_OK")
</pallas_src>

<mosaic_0001>
module attributes {stable_mosaic.version = 11 : i64} {
  func.func @_fft2_kernel(%arg0: i32, %arg1: memref<2x512xf32, #tpu.memory_space<vmem>>, %arg2: memref<256x256xbf16, #tpu.memory_space<vmem>>, %arg3: memref<256x256xbf16, #tpu.memory_space<vmem>>, %arg4: memref<256x256xbf16, #tpu.memory_space<vmem>>, %arg5: memref<2x768xf32, #tpu.memory_space<vmem>>) attributes {dimension_semantics = [#tpu.dimension_semantics<parallel>], iteration_bounds = array<i64: 1>, scalar_prefetch = 0 : i64, scratch_operands = 0 : i64, tpu.core_type = #tpu.core_type<tc>, window_params = [{transform_indices = @transform_0, window_bounds = array<i64: 2, 512>}, {pipeline_mode = #tpu.pipeline_mode<synchronous>, transform_indices = @transform_1, window_bounds = array<i64: 256, 256>}, {pipeline_mode = #tpu.pipeline_mode<synchronous>, transform_indices = @transform_2, window_bounds = array<i64: 256, 256>}, {pipeline_mode = #tpu.pipeline_mode<synchronous>, transform_indices = @transform_3, window_bounds = array<i64: 256, 256>}, {transform_indices = @transform_4, window_bounds = array<i64: 2, 768>}]} {
    %c0 = arith.constant 0 : index
    %c0_0 = arith.constant 0 : index
    %0 = vector.load %arg1[%c0, %c0_0] : memref<2x512xf32, #tpu.memory_space<vmem>>, vector<2x512xf32>
    %1 = vector.extract_strided_slice %0 {offsets = [0, 0], sizes = [2, 256], strides = [1, 1]} : vector<2x512xf32> to vector<2x256xf32>
    %2 = arith.truncf %1 : vector<2x256xf32> to vector<2x256xbf16>
    %3 = vector.extract_strided_slice %0 {offsets = [0, 256], sizes = [2, 256], strides = [1, 1]} : vector<2x512xf32> to vector<2x256xf32>
    %4 = arith.truncf %3 : vector<2x256xf32> to vector<2x256xbf16>
    %5 = vector.extract_strided_slice %0 {offsets = [0, 0], sizes = [2, 256], strides = [1, 1]} : vector<2x512xf32> to vector<2x256xf32>
    %6 = vector.extract_strided_slice %0 {offsets = [0, 256], sizes = [2, 256], strides = [1, 1]} : vector<2x512xf32> to vector<2x256xf32>
    %7 = arith.addf %5, %6 : vector<2x256xf32>
    %8 = arith.truncf %7 : vector<2x256xf32> to vector<2x256xbf16>
    %c0_1 = arith.constant 0 : index
    %c0_2 = arith.constant 0 : index
    %9 = vector.load %arg2[%c0_1, %c0_2] : memref<256x256xbf16, #tpu.memory_space<vmem>>, vector<256x256xbf16>
    %cst = arith.constant dense<0.000000e+00> : vector<2x256xf32>
    %10 = tpu.matmul %2, %9, %cst {dimension_numbers = #tpu.dot_dimension_numbers<[1], [0], [0], [1], [0, 0, 1, 1], [], []>} : vector<2x256xbf16>, vector<256x256xbf16>, vector<2x256xf32> -> vector<2x256xf32>
    %c0_3 = arith.constant 0 : index
    %c0_4 = arith.constant 0 : index
    %11 = vector.load %arg3[%c0_3, %c0_4] : memref<256x256xbf16, #tpu.memory_space<vmem>>, vector<256x256xbf16>
    %cst_5 = arith.constant dense<0.000000e+00> : vector<2x256xf32>
    %12 = tpu.matmul %4, %11, %cst_5 {dimension_numbers = #tpu.dot_dimension_numbers<[1], [0], [0], [1], [0, 0, 1, 1], [], []>} : vector<2x256xbf16>, vector<256x256xbf16>, vector<2x256xf32> -> vector<2x256xf32>
    %c0_6 = arith.constant 0 : index
    %c0_7 = arith.constant 0 : index
    %13 = vector.load %arg4[%c0_6, %c0_7] : memref<256x256xbf16, #tpu.memory_space<vmem>>, vector<256x256xbf16>
    %cst_8 = arith.constant dense<0.000000e+00> : vector<2x256xf32>
    %14 = tpu.matmul %8, %13, %cst_8 {dimension_numbers = #tpu.dot_dimension_numbers<[1], [0], [0], [1], [0, 0, 1, 1], [], []>} : vector<2x256xbf16>, vector<256x256xbf16>, vector<2x256xf32> -> vector<2x256xf32>
    %15 = arith.subf %10, %12 : vector<2x256xf32>
    %16 = arith.subf %14, %10 : vector<2x256xf32>
    %17 = arith.subf %16, %12 : vector<2x256xf32>
    %c0_9 = arith.constant 0 : index
    %c0_10 = arith.constant 0 : index
    %18 = vector.load %arg5[%c0_9, %c0_10] : memref<2x768xf32, #tpu.memory_space<vmem>>, vector<2x256xf32>
    tpu.vector_store %arg5[%c0_9, %c0_10], %15 {strides = array<i32>} : memref<2x768xf32, #tpu.memory_space<vmem>>, vector<2x256xf32>,
    %c0_11 = arith.constant 0 : index
    %c256 = arith.constant 256 : index
    %19 = vector.load %arg5[%c0_11, %c256] : memref<2x768xf32, #tpu.memory_space<vmem>>, vector<2x256xf32>
    tpu.vector_store %arg5[%c0_11, %c256], %17 {strides = array<i32>} : memref<2x768xf32, #tpu.memory_space<vmem>>, vector<2x256xf32>,
    %20 = arith.mulf %15, %15 : vector<2x256xf32>
    %21 = arith.mulf %17, %17 : vector<2x256xf32>
    %22 = arith.addf %20, %21 : vector<2x256xf32>
    %23 = math.sqrt %22 : vector<2x256xf32>
    %c0_12 = arith.constant 0 : index
    %c512 = arith.constant 512 : index
    %24 = vector.load %arg5[%c0_12, %c512] : memref<2x768xf32, #tpu.memory_space<vmem>>, vector<2x256xf32>
    tpu.vector_store %arg5[%c0_12, %c512], %23 {strides = array<i32>} : memref<2x768xf32, #tpu.memory_space<vmem>>, vector<2x256xf32>,
    return
  }
  func.func @transform_0(%arg0: i32) -> (i32, i32) {
    %c0_i32 = arith.constant 0 : i32
    %c0_i32_0 = arith.constant 0 : i32
    return %arg0, %c0_i32 : i32, i32
  }
  func.func @transform_1(%arg0: i32) -> (i32, i32) {
    %c0_i32 = arith.constant 0 : i32
    %c0_i32_0 = arith.constant 0 : i32
    %c0_i32_1 = arith.constant 0 : i32
    return %c0_i32, %c0_i32_0 : i32, i32
  }
  func.func @transform_2(%arg0: i32) -> (i32, i32) {
    %c0_i32 = arith.constant 0 : i32
    %c0_i32_0 = arith.constant 0 : i32
    %c0_i32_1 = arith.constant 0 : i32
    return %c0_i32, %c0_i32_0 : i32, i32
  }
  func.func @transform_3(%arg0: i32) -> (i32, i32) {
    %c0_i32 = arith.constant 0 : i32
    %c0_i32_0 = arith.constant 0 : i32
    %c0_i32_1 = arith.constant 0 : i32
    return %c0_i32, %c0_i32_0 : i32, i32
  }
  func.func @transform_4(%arg0: i32) -> (i32, i32) {
    %c0_i32 = arith.constant 0 : i32
    %c0_i32_0 = arith.constant 0 : i32
    return %arg0, %c0_i32 : i32, i32
  }
}

</mosaic_0001>

<bundles_post_ra>
// kernel: twod_fft_pallas.1
= control target key start
LH: loop header
LB: loop body
LE: loop exit
PB: predicated region body
PF: predicated region fallthrough
CT: control target
= control target key end

     0   :  { %v1074_v36 = vmov 1983009808   ;;  %v22_v38 = vlaneseq  ;;  %s1406_s1 = inlined_call_operand.vmem [shape: bf16[256,256], index: 1, kind: input, shape index: {}]   ;;  %s1407_s2 = inlined_call_operand.vmem [shape: bf16[256,256], index: 2, kind: input, shape index: {}]   ;;  %s1408_s0 = inlined_call_operand.vmem [shape: f32[2,1024], index: 0, kind: input, shape index: {}]   ;;  %s1409_s3 = inlined_call_operand.vmem [shape: bf16[256,256], index: 3, kind: input, shape index: {}]   ;;  %s1410_s4 = inlined_call_operand.vmem [shape: f32[2,768], index: 4, kind: output, shape index: {}]  }
   0x1   :  { %v925_v0 = vld [vmem:[%s1406_s1 + $0x4] ss:$8 sps:$4 sm:$0xff]   ;;  %v929_v2 = vld [vmem:[%s1406_s1] ss:$8 sps:$4 sm:$0xff]   ;;  %v931_v4 = vld [vmem:[%s1406_s1 + $0x14] ss:$8 sps:$4 sm:$0xff]   ;;  %v20_v37 = vunpack.c.l.s4 %v1074_v36 }
   0x2   :  { %v927_v1 = vld [vmem:[%s1407_s2 + $0x4] ss:$8 sps:$4 sm:$0xff]   ;;  %252 = vmatprep.subr.bf16.mxu0 %v925_v0  ;;  %v930_v3 = vld [vmem:[%s1407_s2] ss:$8 sps:$4 sm:$0xff]   ;;  %v933_v5 = vld [vmem:[%s1407_s2 + $0x14] ss:$8 sps:$4 sm:$0xff]  }
   0x3   :  { %485 = vmatprep.subr.bf16.mxu1 %v927_v1  ;;  %253 = vmatpush1.bf16.msra.mxu0 %v929_v2  ;;  %v935_v6 = vld [vmem:[%s1406_s1 + $0x10] ss:$8 sps:$4 sm:$0xff]   ;;  %v937_v8 = vld [vmem:[%s1406_s1 + $0x24] ss:$8 sps:$4 sm:$0xff]   ;;  %v941_v10 = vld [vmem:[%s1406_s1 + $0x20] ss:$8 sps:$4 sm:$0xff]   ;;  %v21_v42 = vunpack.c.0.s8 %v20_v37 }
   0x4   :  { %486 = vmatpush1.bf16.msra.mxu1 %v930_v3  ;;  %254 = vmatprep.subr.bf16.mxu0 %v931_v4  ;;  %v936_v7 = vld [vmem:[%s1407_s2 + $0x10] ss:$8 sps:$4 sm:$0xff]   ;;  %v939_v9 = vld [vmem:[%s1407_s2 + $0x24] ss:$8 sps:$4 sm:$0xff]   ;;  %v942_v11 = vld [vmem:[%s1407_s2 + $0x20] ss:$8 sps:$4 sm:$0xff]  }
   0x5   :  { %487 = vmatprep.subr.bf16.mxu1 %v933_v5  ;;  %v943_v12 = vld [vmem:[%s1406_s1 + $0x34] ss:$8 sps:$4 sm:$0xff]   ;;  %v947_v14 = vld [vmem:[%s1406_s1 + $0x30] ss:$8 sps:$4 sm:$0xff]   ;;  %v949_v16 = vld [vmem:[%s1406_s1 + $0x44] ss:$8 sps:$4 sm:$0xff]  }
   0x6   :  { %v945_v13 = vld [vmem:[%s1407_s2 + $0x34] ss:$8 sps:$4 sm:$0xff]   ;;  %v948_v15 = vld [vmem:[%s1407_s2 + $0x30] ss:$8 sps:$4 sm:$0xff]   ;;  %v951_v17 = vld [vmem:[%s1407_s2 + $0x44] ss:$8 sps:$4 sm:$0xff]  }
   0x7   :  { %255 = vmatpush1.bf16.msra.mxu0 %v935_v6  ;;  %v953_v18 = vld [vmem:[%s1406_s1 + $0x40] ss:$8 sps:$4 sm:$0xff]   ;;  %v955_v20 = vld [vmem:[%s1406_s1 + $0x54] ss:$8 sps:$4 sm:$0xff]   ;;  %v959_v22 = vld [vmem:[%s1406_s1 + $0x50] ss:$8 sps:$4 sm:$0xff]  }
   0x8   :  { %488 = vmatpush1.bf16.msra.mxu1 %v936_v7  ;;  %256 = vmatprep.subr.bf16.mxu0 %v937_v8  ;;  %v954_v19 = vld [vmem:[%s1407_s2 + $0x40] ss:$8 sps:$4 sm:$0xff]   ;;  %v957_v21 = vld [vmem:[%s1407_s2 + $0x54] ss:$8 sps:$4 sm:$0xff]   ;;  %v960_v23 = vld [vmem:[%s1407_s2 + $0x50] ss:$8 sps:$4 sm:$0xff]  }
   0x9   :  { %489 = vmatprep.subr.bf16.mxu1 %v939_v9  ;;  %v961_v24 = vld [vmem:[%s1406_s1 + $0x64] ss:$8 sps:$4 sm:$0xff]   ;;  %v965_v26 = vld [vmem:[%s1406_s1 + $0x60] ss:$8 sps:$4 sm:$0xff]   ;;  %v967_v28 = vld [vmem:[%s1406_s1 + $0x74] ss:$8 sps:$4 sm:$0xff]  }
   0xa   :  { %v963_v25 = vld [vmem:[%s1407_s2 + $0x64] ss:$8 sps:$4 sm:$0xff]   ;;  %v966_v27 = vld [vmem:[%s1407_s2 + $0x60] ss:$8 sps:$4 sm:$0xff]   ;;  %v969_v29 = vld [vmem:[%s1407_s2 + $0x74] ss:$8 sps:$4 sm:$0xff]  }
   0xb   :  { %257 = vmatpush1.bf16.msra.mxu0 %v941_v10  ;;  %v971_v30 = vld [vmem:[%s1406_s1 + $0x70] ss:$8 sps:$4 sm:$0xff]   ;;  %v973_v32 = vld [vmem:[%s1406_s1 + $0x84] ss:$8 sps:$4 sm:$0xff]   ;;  %v977_v34 = vld [vmem:[%s1406_s1 + $0x80] ss:$8 sps:$4 sm:$0xff]  }
   0xc   :  { %490 = vmatpush1.bf16.msra.mxu1 %v942_v11  ;;  %258 = vmatprep.subr.bf16.mxu0 %v943_v12  ;;  %v972_v31 = vld [vmem:[%s1407_s2 + $0x70] ss:$8 sps:$4 sm:$0xff]   ;;  %v975_v33 = vld [vmem:[%s1407_s2 + $0x84] ss:$8 sps:$4 sm:$0xff]   ;;  %v978_v35 = vld [vmem:[%s1407_s2 + $0x80] ss:$8 sps:$4 sm:$0xff]  }
   0xd   :  { %491 = vmatprep.subr.bf16.mxu1 %v945_v13  ;;  %v979_v39 = vld [vmem:[%s1406_s1 + $0x94] ss:$8 sps:$4 sm:$0xff]   ;;  %v983_v41 = vld [vmem:[%s1406_s1 + $0x90] ss:$8 sps:$4 sm:$0xff]   ;;  %v23_v43 = vshrl.u32 %v22_v38, 7  ;;  %v17_v52 = vld [vmem:[%s1408_s0] sm:$0xff] }
   0xe   :  { %v981_v40 = vld [vmem:[%s1407_s2 + $0x94] ss:$8 sps:$4 sm:$0xff]   ;;  %v984_v44 = vld [vmem:[%s1407_s2 + $0x90] ss:$8 sps:$4 sm:$0xff]   ;;  %v985_v45 = vld [vmem:[%s1406_s1 + $0xa4] ss:$8 sps:$4 sm:$0xff]   ;;  %v31_v55 = vcombine.high %v17_v52, %v17_v52 }
   0xf   :  { %259 = vmatpush1.bf16.msra.mxu0 %v947_v14  ;;  %v987_v46 = vld [vmem:[%s1407_s2 + $0xa4] ss:$8 sps:$4 sm:$0xff]   ;;  %v989_v47 = vld [vmem:[%s1406_s1 + $0xa0] ss:$8 sps:$4 sm:$0xff]   ;;  %v24_v49 = vsub.s32 %v21_v42, %v23_v43  ;;  %v991_v50 = vld [vmem:[%s1406_s1 + $0xb4] ss:$8 sps:$4 sm:$0xff]  }
  0x10   :  { %492 = vmatpush1.bf16.msra.mxu1 %v948_v15  ;;  %260 = vmatprep.subr.bf16.mxu0 %v949_v16  ;;  %v990_v48 = vld [vmem:[%s1407_s2 + $0xa0] ss:$8 sps:$4 sm:$0xff]   ;;  %v993_v51 = vld [vmem:[%s1407_s2 + $0xb4] ss:$8 sps:$4 sm:$0xff]   ;;  %v995_v53 = vld [vmem:[%s1406_s1 + $0xb0] ss:$8 sps:$4 sm:$0xff]  }
  0x11   :  { %493 = vmatprep.subr.bf16.mxu1 %v951_v17  ;;  %v25_v54 = vrot.slane %v17_v52, %v24_v49  ;;  %v996_v56 = vld [vmem:[%s1407_s2 + $0xb0] ss:$8 sps:$4 sm:$0xff]   ;;  %v997_v57 = vld [vmem:[%s1406_s1 + $0xc4] ss:$8 sps:$4 sm:$0xff]   ;;  %v38_v60 = vrot.slane %v31_v55, %v24_v49  ;;  %v1001_v61 = vld [vmem:[%s1406_s1 + $0xc0] ss:$8 sps:$4 sm:$0xff]  }
  0x12   :  { %v999_v58 = vld [vmem:[%s1407_s2 + $0xc4] ss:$8 sps:$4 sm:$0xff]   ;;  %v1002_v0 = vld [vmem:[%s1407_s2 + $0xc0] ss:$8 sps:$4 sm:$0xff]   ;;  %v44_v1 = vrot.slane %v17_v52, 4 }
  0x13   :  { %261 = vmatpush1.bf16.msra.mxu0 %v953_v18  ;;  %v26_v59 = vcombine.high %v25_v54, %v25_v54  ;;  %v39_v63 = vcombine.high %v38_v60, %v38_v60  ;;  %v1003_v2 = vld [vmem:[%s1406_s1 + $0xd4] ss:$8 sps:$4 sm:$0xff]   ;;  %v1007_v5 = vld [vmem:[%s1406_s1 + $0xd0] ss:$8 sps:$4 sm:$0xff]   ;;  %v1009_v8 = vld [vmem:[%s1406_s1 + $0xe4] ss:$8 sps:$4 sm:$0xff]  }
  0x14   :  { %494 = vmatpush1.bf16.msra.mxu1 %v954_v19  ;;  %262 = vmatprep.subr.bf16.mxu0 %v955_v20  ;;  %v1005_v3 = vld [vmem:[%s1407_s2 + $0xd4] ss:$8 sps:$4 sm:$0xff]   ;;  %v1008_v6 = vld [vmem:[%s1407_s2 + $0xd0] ss:$8 sps:$4 sm:$0xff]   ;;  %v46_v7 = vadd.f32 %v44_v1, %v17_v52  ;;  %v1011_v9 = vld [vmem:[%s1407_s2 + $0xe4] ss:$8 sps:$4 sm:$0xff]   ;;  %v29_v19 = vpack.c.bf16 %v25_v54, %v25_v54  ;;  %v42_v20 = vpack.c.bf16 %v38_v60, %v38_v60 }
  0x15   :  { %495 = vmatprep.subr.bf16.mxu1 %v957_v21  ;;  %v30_v62 = vpack.c.bf16 %v26_v59, %v26_v59  ;;  %v43_v4 = vpack.c.bf16 %v39_v63, %v39_v63  ;;  %v1013_v10 = vld [vmem:[%s1406_s1 + $0xe0] ss:$8 sps:$4 sm:$0xff]   ;;  %v1015_v13 = vld [vmem:[%s1406_s1 + $0xf4] ss:$8 sps:$4 sm:$0xff]   ;;  %v1019_v15 = vld [vmem:[%s1406_s1 + $0xf0] ss:$8 sps:$4 sm:$0xff]  }
  0x16   :  { %v1014_v11 = vld [vmem:[%s1407_s2 + $0xe0] ss:$8 sps:$4 sm:$0xff]   ;;  %v1283_v12 = vrot.slane %v46_v7, %v24_v49  ;;  %v1017_v14 = vld [vmem:[%s1407_s2 + $0xf4] ss:$8 sps:$4 sm:$0xff]   ;;  %v1020_v16 = vld [vmem:[%s1407_s2 + $0xf0] ss:$8 sps:$4 sm:$0xff]  }
  0x17   :  { %263 = vmatpush1.bf16.msra.mxu0 %v959_v22  ;;  %284 = vmatprep.mubr.bf16.mxu0 %v30_v62  ;;  %v1024_v18 = vld [vmem:[%s1409_s3 + $0x4] ss:$8 sps:$4 sm:$0xff]   ;;  %v1022_v21 = vld [vmem:[%s1409_s3] ss:$8 sps:$4 sm:$0xff]   ;;  %v1043_v36 = vld [vmem:[%s1409_s3 + $0x70] ss:$8 sps:$4 sm:$0xff]  }
  0x18   :  { %496 = vmatpush1.bf16.msra.mxu1 %v960_v23  ;;  %264 = vmatprep.subr.bf16.mxu0 %v961_v24  ;;  %v55_v17 = vcombine.high %v1283_v12, %v1283_v12  ;;  %v1027_v23 = vld [vmem:[%s1409_s3 + $0x14] ss:$8 sps:$4 sm:$0xff]   ;;  %v1025_v24 = vld [vmem:[%s1409_s3 + $0x10] ss:$8 sps:$4 sm:$0xff]   ;;  %v1048_v37 = vld [vmem:[%s1409_s3 + $0x84] ss:$8 sps:$4 sm:$0xff]  }
  0x19   :  { %497 = vmatprep.subr.bf16.mxu1 %v963_v25  ;;  %517 = vmatprep.mubr.bf16.mxu1 %v43_v4  ;;  %v1030_v25 = vld [vmem:[%s1409_s3 + $0x24] ss:$8 sps:$4 sm:$0xff]   ;;  %v1046_v38 = vld [vmem:[%s1409_s3 + $0x80] ss:$8 sps:$4 sm:$0xff]   ;;  %v1057_v43 = vld [vmem:[%s1409_s3 + $0xb4] ss:$8 sps:$4 sm:$0xff]  }
  0x1a   :  { %v59_v22 = vpack.c.bf16 %v55_v17, %v55_v17  ;;  %v1052_v42 = vld [vmem:[%s1409_s3 + $0xa0] ss:$8 sps:$4 sm:$0xff]   ;;  %v1066_v49 = vld [vmem:[%s1409_s3 + $0xe4] ss:$8 sps:$4 sm:$0xff]   ;;  %v1067_v52 = vld [vmem:[%s1409_s3 + $0xf0] ss:$8 sps:$4 sm:$0xff]  }
  0x1b   :  { %265 = vmatpush1.bf16.msra.mxu0 %v965_v26  ;;  %v1028_v26 = vld [vmem:[%s1409_s3 + $0x20] ss:$8 sps:$4 sm:$0xff]  }
  0x1c   :  { %498 = vmatpush1.bf16.msra.mxu1 %v966_v27  ;;  %266 = vmatprep.subr.bf16.mxu0 %v967_v28  ;;  %v1033_v27 = vld [vmem:[%s1409_s3 + $0x34] ss:$8 sps:$4 sm:$0xff]   ;;  %v1031_v28 = vld [vmem:[%s1409_s3 + $0x30] ss:$8 sps:$4 sm:$0xff]  }
  0x1d   :  { %499 = vmatprep.subr.bf16.mxu1 %v969_v29  ;;  %v1036_v29 = vld [vmem:[%s1409_s3 + $0x44] ss:$8 sps:$4 sm:$0xff]  }
  0x1f   :  { %267 = vmatpush1.bf16.msra.mxu0 %v971_v30  ;;  %v1034_v30 = vld [vmem:[%s1409_s3 + $0x40] ss:$8 sps:$4 sm:$0xff]  }
  0x20   :  { %500 = vmatpush1.bf16.msra.mxu1 %v972_v31  ;;  %268 = vmatprep.subr.bf16.mxu0 %v973_v32  ;;  %v1039_v31 = vld [vmem:[%s1409_s3 + $0x54] ss:$8 sps:$4 sm:$0xff]   ;;  %v1037_v32 = vld [vmem:[%s1409_s3 + $0x50] ss:$8 sps:$4 sm:$0xff]  }
  0x21   :  { %501 = vmatprep.subr.bf16.mxu1 %v975_v33  ;;  %v1042_v33 = vld [vmem:[%s1409_s3 + $0x64] ss:$8 sps:$4 sm:$0xff]  }
  0x23   :  { %269 = vmatpush1.bf16.msra.mxu0 %v977_v34  ;;  %v1040_v34 = vld [vmem:[%s1409_s3 + $0x60] ss:$8 sps:$4 sm:$0xff]  }
  0x24   :  { %502 = vmatpush1.bf16.msra.mxu1 %v978_v35  ;;  %270 = vmatprep.subr.bf16.mxu0 %v979_v39  ;;  %v1045_v35 = vld [vmem:[%s1409_s3 + $0x74] ss:$8 sps:$4 sm:$0xff]  }
  0x25   :  { %503 = vmatprep.subr.bf16.mxu1 %v981_v40  ;;  %v1051_v39 = vld [vmem:[%s1409_s3 + $0x94] ss:$8 sps:$4 sm:$0xff]   ;;  %v1049_v40 = vld [vmem:[%s1409_s3 + $0x90] ss:$8 sps:$4 sm:$0xff]  }
  0x27   :  { %271 = vmatpush1.bf16.msra.mxu0 %v983_v41  ;;  %v1054_v41 = vld [vmem:[%s1409_s3 + $0xa4] ss:$8 sps:$4 sm:$0xff]  }
  0x28   :  { %504 = vmatpush1.bf16.msra.mxu1 %v984_v44  ;;  %272 = vmatprep.subr.bf16.mxu0 %v985_v45  ;;  %v1055_v44 = vld [vmem:[%s1409_s3 + $0xb0] ss:$8 sps:$4 sm:$0xff]   ;;  %v1060_v45 = vld [vmem:[%s1409_s3 + $0xc4] ss:$8 sps:$4 sm:$0xff]  }
  0x29   :  { %505 = vmatprep.subr.bf16.mxu1 %v987_v46  ;;  %v1058_v46 = vld [vmem:[%s1409_s3 + $0xc0] ss:$8 sps:$4 sm:$0xff]  }
  0x2b   :  { %273 = vmatpush1.bf16.msra.mxu0 %v989_v47  ;;  %v1063_v47 = vld [vmem:[%s1409_s3 + $0xd4] ss:$8 sps:$4 sm:$0xff]  }
  0x2c   :  { %506 = vmatpush1.bf16.msra.mxu1 %v990_v48  ;;  %274 = vmatprep.subr.bf16.mxu0 %v991_v50  ;;  %v1061_v48 = vld [vmem:[%s1409_s3 + $0xd0] ss:$8 sps:$4 sm:$0xff]   ;;  %v1064_v50 = vld [vmem:[%s1409_s3 + $0xe0] ss:$8 sps:$4 sm:$0xff]  }
  0x2d   :  { %507 = vmatprep.subr.bf16.mxu1 %v993_v51  ;;  %v1069_v51 = vld [vmem:[%s1409_s3 + $0xf4] ss:$8 sps:$4 sm:$0xff]  }
  0x2f   :  { %275 = vmatpush1.bf16.msra.mxu0 %v995_v53  ;;  %v58_v53 = vpack.c.bf16 %v1283_v12, %v1283_v12 }
  0x30   :  { %508 = vmatpush1.bf16.msra.mxu1 %v996_v56  ;;  %276 = vmatprep.subr.bf16.mxu0 %v997_v57 }
  0x31   :  { %509 = vmatprep.subr.bf16.mxu1 %v999_v58 }
  0x33   :  { %277 = vmatpush1.bf16.msra.mxu0 %v1001_v61 }
  0x34   :  { %510 = vmatpush1.bf16.msra.mxu1 %v1002_v0  ;;  %278 = vmatprep.subr.bf16.mxu0 %v1003_v2 }
  0x35   :  { %511 = vmatprep.subr.bf16.mxu1 %v1005_v3 }
  0x37   :  { %279 = vmatpush1.bf16.msra.mxu0 %v1007_v5 }
  0x38   :  { %512 = vmatpush1.bf16.msra.mxu1 %v1008_v6  ;;  %280 = vmatprep.subr.bf16.mxu0 %v1009_v8 }
  0x39   :  { %513 = vmatprep.subr.bf16.mxu1 %v1011_v9 }
  0x3b   :  { %281 = vmatpush1.bf16.msra.mxu0 %v1013_v10 }
  0x3c   :  { %514 = vmatpush1.bf16.msra.mxu1 %v1014_v11  ;;  %282 = vmatprep.subr.bf16.mxu0 %v1015_v13 }
  0x3d   :  { %515 = vmatprep.subr.bf16.mxu1 %v1017_v14 }
  0x3f   :  { %283 = vmatpush1.bf16.msra.mxu0 %v1019_v15 }
  0x40   :  { %516 = vmatpush1.bf16.msra.mxu1 %v1020_v16  ;;  %718 = vmatprep.subr.bf16.mxu0 %v1024_v18 }
  0x42   :  { %285 = vmatmul.mubr.bf16.vlgmr.msra.gmra.mrb[0].mxu0 %v29_v19 }
  0x43   :  { %518 = vmatmul.mubr.bf16.vlgmr.msra.gmra.mrb[0].mxu1 %v42_v20  ;;  %719 = vmatpush1.bf16.msra.mxu0 %v1022_v21 }
  0x44   :  { %750 = vmatprep.mubr.bf16.mxu0 %v59_v22  ;;  %720 = vmatprep.subr.bf16.mxu0 %v1027_v23 }
  0x47   :  { %721 = vmatpush1.bf16.msra.mxu0 %v1025_v24 }
  0x48   :  { %722 = vmatprep.subr.bf16.mxu0 %v1030_v25 }
  0x4b   :  { %723 = vmatpush1.bf16.msra.mxu0 %v1028_v26 }
  0x4c   :  { %724 = vmatprep.subr.bf16.mxu0 %v1033_v27 }
  0x4f   :  { %725 = vmatpush1.bf16.msra.mxu0 %v1031_v28 }
  0x50   :  { %726 = vmatprep.subr.bf16.mxu0 %v1036_v29 }
  0x53   :  { %727 = vmatpush1.bf16.msra.mxu0 %v1034_v30 }
  0x54   :  { %728 = vmatprep.subr.bf16.mxu0 %v1039_v31 }
  0x57   :  { %729 = vmatpush1.bf16.msra.mxu0 %v1037_v32 }
  0x58   :  { %730 = vmatprep.subr.bf16.mxu0 %v1042_v33 }
  0x5b   :  { %731 = vmatpush1.bf16.msra.mxu0 %v1040_v34 }
  0x5c   :  { %732 = vmatprep.subr.bf16.mxu0 %v1045_v35 }
  0x5f   :  { %733 = vmatpush1.bf16.msra.mxu0 %v1043_v36 }
  0x60   :  { %734 = vmatprep.subr.bf16.mxu0 %v1048_v37 }
  0x63   :  { %735 = vmatpush1.bf16.msra.mxu0 %v1046_v38 }
  0x64   :  { %736 = vmatprep.subr.bf16.mxu0 %v1051_v39 }
  0x67   :  { %737 = vmatpush1.bf16.msra.mxu0 %v1049_v40 }
  0x68   :  { %738 = vmatprep.subr.bf16.mxu0 %v1054_v41 }
  0x6b   :  { %739 = vmatpush1.bf16.msra.mxu0 %v1052_v42 }
  0x6c   :  { %740 = vmatprep.subr.bf16.mxu0 %v1057_v43 }
  0x6f   :  { %741 = vmatpush1.bf16.msra.mxu0 %v1055_v44 }
  0x70   :  { %742 = vmatprep.subr.bf16.mxu0 %v1060_v45 }
  0x73   :  { %743 = vmatpush1.bf16.msra.mxu0 %v1058_v46 }
  0x74   :  { %744 = vmatprep.subr.bf16.mxu0 %v1063_v47 }
  0x77   :  { %745 = vmatpush1.bf16.msra.mxu0 %v1061_v48 }
  0x78   :  { %746 = vmatprep.subr.bf16.mxu0 %v1066_v49 }
  0x7b   :  { %747 = vmatpush1.bf16.msra.mxu0 %v1064_v50 }
  0x7c   :  { %748 = vmatprep.subr.bf16.mxu0 %v1069_v51 }
  0x7f   :  { %749 = vmatpush1.bf16.msra.mxu0 %v1067_v52 }
  0x82   :  { %751 = vmatmul.mubr.bf16.vlgmr.msra.gmra.mrb[4].mxu0 %v58_v53 }
 0x115   :  { %v286_v54 = vpop.f32.mrb[0].mxu0 }
 0x116   :  { %v519_v55 = vpop.f32.mrb[0].mxu1  ;;  %v288_v57 = vpop.f32.mrb[1].mxu0 }
 0x117   :  { %v759_v56 = vsub.f32 %v286_v54, %v519_v55  ;;  %v521_v58 = vpop.f32.mrb[1].mxu1  ;;  %v290_v60 = vpop.f32.mrb[2].mxu0 }
 0x118   :  { %v760_v59 = vsub.f32 %v288_v57, %v521_v58  ;;  %v523_v61 = vpop.f32.mrb[2].mxu1  ;;  %v291_v62 = vpop.f32.mrb[3].mxu0 }
 0x119   :  { %v524_v63 = vpop.f32.mrb[3].mxu1  ;;  %v789_v9 = vmul.f32 %v759_v56, %v759_v56 }
 0x11a   :  { %v767_v0 = vcombine.low %v759_v56, %v760_v59  ;;  %v790_v11 = vmul.f32 %v760_v59, %v760_v59 }
 0x11c   :  { %921 = vst.sshfl [vmem:[%s1410_s4] sm:$0x33 pattern:$0x76325410] %v767_v0 }
 0x155   :  { %v752_v1 = vpop.f32.mrb[4].mxu0 }
 0x156   :  { %v761_v2 = vsub.f32 %v752_v1, %v286_v54  ;;  %v754_v3 = vpop.f32.mrb[5].mxu0 }
 0x157   :  { %v762_v4 = vsub.f32 %v754_v3, %v288_v57  ;;  %v756_v5 = vpop.f32.mrb[6].mxu0 }
 0x158   :  { %v763_v6 = vsub.f32 %v761_v2, %v519_v55  ;;  %v757_v7 = vpop.f32.mrb[7].mxu0 }
 0x159   :  { %v764_v8 = vsub.f32 %v762_v4, %v521_v58 }
 0x15a   :  { %v791_v10 = vmul.f32 %v763_v6, %v763_v6 }
 0x15b   :  { %v779_v12 = vcombine.low %v763_v6, %v764_v8  ;;  %v792_v13 = vmul.f32 %v764_v8, %v764_v8 }
 0x15c   :  { %v793_v14 = vadd.f32 %v791_v10, %v789_v9 }
 0x15d   :  { %922 = vst.sshfl [vmem:[%s1410_s4 + $0x4] sm:$0x33 pattern:$0x76325410] %v779_v12  ;;  %v794_v15 = vadd.f32 %v792_v13, %v790_v11 }
 0x15e   :  { %1070 = vrsqrt.f32 %v793_v14  ;;  %vm797_vm0 = vcmp.eq.f32.partialorder %v793_v14, inf  ;;  %v800_v19 = vand.u32 2147483648, %v793_v14  ;;  %vm799_vm1 = vcmp.eq.f32.partialorder %v793_v14, 0.0 }
 0x15f   :  { %1072 = vrsqrt.f32 %v794_v15  ;;  %vm804_vm2 = vcmp.eq.f32.partialorder %v794_v15, inf  ;;  %v807_v22 = vand.u32 2147483648, %v794_v15  ;;  %vm806_vm3 = vcmp.eq.f32.partialorder %v794_v15, 0.0 }
 0x168   :  { %v1071_v16 = vpop.eup %1070 }
 0x169   :  { %v1073_v17 = vpop.eup %1072  ;;  %v796_v18 = vmul.f32 %v1071_v16, %v793_v14 }
 0x16a   :  { %v803_v20 = vmul.f32 %v1073_v17, %v794_v15 }
 0x16b   :  { %v798_v21 = vsel %vm797_vm0, %v793_v14, %v796_v18 }
 0x16c   :  { %v801_v23 = vsel %vm799_vm1, %v800_v19, %v798_v21  ;;  %v805_v24 = vsel %vm804_vm2, %v794_v15, %v803_v20 }
 0x16d   :  { %v808_v25 = vsel %vm806_vm3, %v807_v22, %v805_v24 }
 0x16e   :  { %v811_v26 = vcombine.low %v801_v23, %v808_v25 }
 0x170   :  { %923 = vst.sshfl [vmem:[%s1410_s4 + $0x8] sm:$0x33 pattern:$0x76325410] %v811_v26 }

</bundles_post_ra>
